<compile_context>
chip_gen: v5e
topology: v5e:2x2
jax: 0.10.0
libtpu: 0.0.40
codegen_flags: <defaults>
</compile_context>

<pallas_src>
import functools

import jax
import jax.numpy as jnp
from jax.experimental import pallas as pl
from jax.experimental.pallas import tpu as pltpu

_LANES = 128
_SUBLANES = 8

# Size tiles to the chip's VMEM (v5e/v6e: 128 MiB -> 8192 rows = 32 MiB of
# double-buffered inputs; v7x: 64 MiB -> 4096 rows = 16 MiB).
try:
    _VMEM_CAP = int(pltpu.get_tpu_info().vmem_capacity_bytes)
except Exception:  # conservative fallback
    _VMEM_CAP = 64 * 1024 * 1024
if _VMEM_CAP >= 128 * 1024 * 1024:
    _MAX_BLOCK_ROWS = 8192
    _VMEM_LIMIT = 64 * 1024 * 1024
else:
    _MAX_BLOCK_ROWS = 4096
    _VMEM_LIMIT = 40 * 1024 * 1024


def _strength_reduced_pow(base, exponent):
    """(base ** exponent); integer exponents become VPU multiplies (no EUP pow)."""
    if float(exponent).is_integer() and 0 <= int(exponent) <= 16:
        n = int(exponent)
        w = jnp.ones_like(base)
        sq = base
        while n > 0:
            if n & 1:
                w = w * sq
            n >>= 1
            if n:
                sq = sq * sq
        return w
    return jnp.power(base, exponent)


def _loss_kernel(p_ref, t_ref, e_ref, z_ref, o_ref, acc_ref, *,
                 exponent, block_rows, total_rows):
    c = pl.program_id(0)          # shard ("parallel") axis
    i = pl.program_id(1)          # row-block (reduction) axis
    n_inner = pl.num_programs(1)

    @pl.when(i == 0)
    def _():
        acc_ref[...] = jnp.zeros_like(acc_ref)

    gb = c * n_inner + i                        # logical (unclamped) block index
    valid_rows = total_rows - gb * block_rows   # scalar: in-array rows of this block

    def compute_val():
        p = p_ref[...].astype(jnp.float32)
        t = t_ref[...].astype(jnp.float32)
        e = e_ref[...].astype(jnp.float32)
        z = z_ref[...].astype(jnp.float32)
        z_weight = _strength_reduced_pow(1.0 - z, exponent) + 0.05
        diff = p - t
        # approx reciprocal -> EUP slot (idle here); VALU slot stays free.
        return z_weight * diff * diff * pl.reciprocal(e, approx=True)

    def accumulate(val):
        # Fold the (block_rows,128) tile into one (8,128) vreg-row with VPU adds.
        acc_ref[...] += val.reshape(-1, _SUBLANES, _LANES).sum(axis=0)

    # Steady state: full in-bounds blocks -- pure VPU, no per-element masking.
    @pl.when(valid_rows >= block_rows)
    def _():
        accumulate(compute_val())

    # Ragged final logical block (at most one): mask the garbage trailing rows.
    # Statically omitted when the rows divide evenly.
    if total_rows % block_rows != 0:
        @pl.when(jnp.logical_and(valid_rows > 0, valid_rows < block_rows))
        def _():
            val = compute_val()
            rid = jax.lax.broadcasted_iota(jnp.int32, (block_rows, _LANES), 0)
            accumulate(jnp.where(rid < valid_rows, val, 0.0))

    # Blocks with valid_rows <= 0 are clamped duplicates from the shard split: skipped.

    @pl.when(i == n_inner - 1)
    def _():
        o_ref[0] = acc_ref[...]


def weighted_custom_loss(preds, targets, target_err, target_z, exponent: float):
    """mean( ((1 - z)**exponent + 0.05) * (preds - targets)**2 / target_err )"""
    assert preds.shape == targets.shape == target_err.shape == target_z.shape
    n_total = preds.size

    # Flatten only (free reshape of contiguous arrays); keep native dtype so a
    # bf16/fp16 input streams at its native width (kernel upcasts per-tile).
    flats = [jnp.ravel(x) for x in (preds, targets, target_err, target_z)]

    # Kernel handles the largest lane-aligned (multiple-of-128) prefix; the <128
    # element remainder is a trivial wrapper expression -> no big pad/copy ever.
    rows = n_total // _LANES
    n_main = rows * _LANES

    tail_sum = jnp.float32(0.0)
    if n_main < n_total:
        p_t, t_t, e_t, z_t = (f[n_main:].astype(jnp.float32) for f in flats)
        d = p_t - t_t
        tail_sum = jnp.sum(
            (_strength_reduced_pow(1.0 - z_t, float(exponent)) + 0.05) * d * d / e_t)

    if rows == 0:
        return tail_sum / jnp.float32(n_total)

    mains = [f if n_main == f.size else f[:n_main] for f in flats]
    mains2d = [m.reshape(rows, _LANES) for m in mains]

    # Block rows: multiple of 8 (for the (8,128) fold), capped by the VMEM budget.
    block_rows = min(_MAX_BLOCK_ROWS,
                     ((rows + _SUBLANES - 1) // _SUBLANES) * _SUBLANES)
    n_blocks = pl.cdiv(rows, block_rows)
    n_shards = 2 if n_blocks >= 2 else 1
    inner = pl.cdiv(n_blocks, n_shards)

    def in_map(c, i):
        # Clamp so duplicated shard blocks still index inside the array; the kernel
        # skips their contribution via the scalar valid_rows guard.
        return (jnp.minimum(c * inner + i, n_blocks - 1), 0)

    block = pl.BlockSpec((block_rows, _LANES), in_map)

    kernel = functools.partial(
        _loss_kernel, exponent=float(exponent),
        block_rows=block_rows, total_rows=rows)

    partials = pl.pallas_call(
        kernel,
        out_shape=jax.ShapeDtypeStruct((n_shards, _SUBLANES, _LANES), jnp.float32),
        grid_spec=pltpu.PrefetchScalarGridSpec(
            num_scalar_prefetch=0,
            grid=(n_shards, inner),
            in_specs=[block, block, block, block],
            out_specs=pl.BlockSpec((1, _SUBLANES, _LANES), lambda c, i: (c, 0, 0)),
            scratch_shapes=[pltpu.VMEM((_SUBLANES, _LANES), jnp.float32)],
        ),
        compiler_params=pltpu.CompilerParams(
            dimension_semantics=("parallel", "arbitrary"),
            vmem_limit_bytes=_VMEM_LIMIT,
        ),
    )(*mains2d)

    return (jnp.sum(partials) + tail_sum) / jnp.float32(n_total)


def _reference(preds, targets, target_err, target_z, exponent):
    z_weight = (1.0 - target_z) ** exponent + 0.05
    return jnp.mean(z_weight * (preds - targets) * (preds - targets) / target_err)


if __name__ == "__main__":
    key = jax.random.PRNGKey(0)
    k1, k2, k3, k4 = jax.random.split(key, 4)

    # Small NCHW-shaped inputs consistent with the module's elementwise forward.
    shape = (2, 4, 16, 16)
    exponent = 2.0

    preds = jax.random.normal(k1, shape, dtype=jnp.float32)
    targets = jax.random.normal(k2, shape, dtype=jnp.float32)
    # target_err is a std-like positive quantity
    target_err = jax.random.uniform(k3, shape, dtype=jnp.float32, minval=0.5, maxval=2.0)
    # target_z in [0, 1)
    target_z = jax.random.uniform(k4, shape, dtype=jnp.float32, minval=0.0, maxval=1.0)

    out = weighted_custom_loss(preds, targets, target_err, target_z, exponent)
    out = jax.block_until_ready(out)

    ref = _reference(preds, targets, target_err, target_z, exponent)
    # rtol relaxed vs. a true divide because of pl.reciprocal(approx=True) (~2^-12).
    assert jnp.allclose(out, ref, rtol=1e-3, atol=1e-6), (out, ref)

    print("KERNEL_OK")
</pallas_src>

<mosaic_0001>
module attributes {stable_mosaic.version = 11 : i64} {
  func.func @_loss_kernel(%arg0: i32, %arg1: i32, %arg2: memref<16x128xf32, #tpu.memory_space<vmem>>, %arg3: memref<16x128xf32, #tpu.memory_space<vmem>>, %arg4: memref<16x128xf32, #tpu.memory_space<vmem>>, %arg5: memref<16x128xf32, #tpu.memory_space<vmem>>, %arg6: memref<1x8x128xf32, #tpu.memory_space<vmem>>, %arg7: memref<8x128xf32, #tpu.memory_space<vmem>>) attributes {dimension_semantics = [#tpu.dimension_semantics<parallel>, #tpu.dimension_semantics<arbitrary>], iteration_bounds = array<i64: 1, 1>, scalar_prefetch = 0 : i64, scratch_operands = 1 : i64, tpu.core_type = #tpu.core_type<tc>, window_params = [{transform_indices = @transform_0, window_bounds = array<i64: 16, 128>}, {transform_indices = @transform_1, window_bounds = array<i64: 16, 128>}, {transform_indices = @transform_2, window_bounds = array<i64: 16, 128>}, {transform_indices = @transform_3, window_bounds = array<i64: 16, 128>}, {transform_indices = @transform_4, window_bounds = array<i64: 1, 8, 128>}]} {
    %c0_i32 = arith.constant 0 : i32
    %0 = arith.cmpi eq, %arg1, %c0_i32 : i32
    %1 = arith.extui %0 : i1 to i32
    %c0_i32_0 = arith.constant 0 : i32
    %2 = arith.cmpi ne, %1, %c0_i32_0 : i32
    scf.if %2 {
      %cst = arith.constant 0.000000e+00 : f32
      %13 = vector.broadcast %cst : f32 to vector<8x128xf32>
      %c0 = arith.constant 0 : index
      %c0_6 = arith.constant 0 : index
      %14 = vector.load %arg7[%c0, %c0_6] : memref<8x128xf32, #tpu.memory_space<vmem>>, vector<8x128xf32>
      tpu.vector_store %arg7[%c0, %c0_6], %13 {strides = array<i32>} : memref<8x128xf32, #tpu.memory_space<vmem>>, vector<8x128xf32>,
    } else {
    }
    %c1_i32 = arith.constant 1 : i32
    %3 = arith.muli %arg0, %c1_i32 : i32
    %4 = arith.addi %3, %arg1 : i32
    %c16_i32 = arith.constant 16 : i32
    %5 = arith.muli %4, %c16_i32 : i32
    %c16_i32_1 = arith.constant 16 : i32
    %6 = arith.subi %c16_i32_1, %5 : i32
    %c16_i32_2 = arith.constant 16 : i32
    %7 = arith.cmpi sge, %6, %c16_i32_2 : i32
    %8 = arith.extui %7 : i1 to i32
    %c0_i32_3 = arith.constant 0 : i32
    %9 = arith.cmpi ne, %8, %c0_i32_3 : i32
    scf.if %9 {
      %c0 = arith.constant 0 : index
      %c0_6 = arith.constant 0 : index
      %13 = vector.load %arg2[%c0, %c0_6] : memref<16x128xf32, #tpu.memory_space<vmem>>, vector<16x128xf32>
      %c0_7 = arith.constant 0 : index
      %c0_8 = arith.constant 0 : index
      %14 = vector.load %arg3[%c0_7, %c0_8] : memref<16x128xf32, #tpu.memory_space<vmem>>, vector<16x128xf32>
      %c0_9 = arith.constant 0 : index
      %c0_10 = arith.constant 0 : index
      %15 = vector.load %arg4[%c0_9, %c0_10] : memref<16x128xf32, #tpu.memory_space<vmem>>, vector<16x128xf32>
      %c0_11 = arith.constant 0 : index
      %c0_12 = arith.constant 0 : index
      %16 = vector.load %arg5[%c0_11, %c0_12] : memref<16x128xf32, #tpu.memory_space<vmem>>, vector<16x128xf32>
      %cst = arith.constant 1.000000e+00 : f32
      %17 = vector.broadcast %cst : f32 to vector<16x128xf32>
      %18 = arith.subf %17, %16 : vector<16x128xf32>
      %cst_13 = arith.constant 1.000000e+00 : f32
      %19 = vector.broadcast %cst_13 : f32 to vector<16x128xf32>
      %20 = arith.mulf %18, %18 : vector<16x128xf32>
      %21 = arith.mulf %19, %20 : vector<16x128xf32>
      %cst_14 = arith.constant 5.000000e-02 : f32
      %22 = vector.broadcast %cst_14 : f32 to vector<16x128xf32>
      %23 = arith.addf %21, %22 : vector<16x128xf32>
      %24 = arith.subf %13, %14 : vector<16x128xf32>
      %25 = arith.mulf %23, %24 : vector<16x128xf32>
      %26 = arith.mulf %25, %24 : vector<16x128xf32>
      %27 = tpu.reciprocal %15 {approx = true} : vector<16x128xf32> -> vector<16x128xf32>
      %28 = arith.mulf %26, %27 : vector<16x128xf32>
      %c0_15 = arith.constant 0 : index
      %c0_16 = arith.constant 0 : index
      %29 = vector.load %arg7[%c0_15, %c0_16] : memref<8x128xf32, #tpu.memory_space<vmem>>, vector<8x128xf32>
      %30 = vector.shape_cast %28 : vector<16x128xf32> to vector<2x8x128xf32>
      %cst_17 = arith.constant dense<0.000000e+00> : vector<8x128xf32>
      %31 = vector.multi_reduction <add>, %30, %cst_17 [0] : vector<2x8x128xf32> to vector<8x128xf32>
      %32 = arith.addf %29, %31 : vector<8x128xf32>
      %c0_18 = arith.constant 0 : index
      %c0_19 = arith.constant 0 : index
      %33 = vector.load %arg7[%c0_18, %c0_19] : memref<8x128xf32, #tpu.memory_space<vmem>>, vector<8x128xf32>
      tpu.vector_store %arg7[%c0_18, %c0_19], %32 {strides = array<i32>} : memref<8x128xf32, #tpu.memory_space<vmem>>, vector<8x128xf32>,
    } else {
    }
    %c0_i32_4 = arith.constant 0 : i32
    %10 = arith.cmpi eq, %arg1, %c0_i32_4 : i32
    %11 = arith.extui %10 : i1 to i32
    %c0_i32_5 = arith.constant 0 : i32
    %12 = arith.cmpi ne, %11, %c0_i32_5 : i32
    scf.if %12 {
      %c0 = arith.constant 0 : index
      %c0_6 = arith.constant 0 : index
      %13 = vector.load %arg7[%c0, %c0_6] : memref<8x128xf32, #tpu.memory_space<vmem>>, vector<8x128xf32>
      %c0_7 = arith.constant 0 : index
      %c0_8 = arith.constant 0 : index
      %c0_9 = arith.constant 0 : index
      %14 = vector.load %arg6[%c0_7, %c0_8, %c0_9] : memref<1x8x128xf32, #tpu.memory_space<vmem>>, vector<1x8x128xf32>
      %15 = vector.shape_cast %14 : vector<1x8x128xf32> to vector<8x128xf32>
      %16 = vector.shape_cast %13 : vector<8x128xf32> to vector<1x8x128xf32>
      tpu.vector_store %arg6[%c0_7, %c0_8, %c0_9], %16 {strides = array<i32>} : memref<1x8x128xf32, #tpu.memory_space<vmem>>, vector<1x8x128xf32>,
    } else {
    }
    return
  }
  func.func @transform_0(%arg0: i32, %arg1: i32) -> (i32, i32) {
    %c1_i32 = arith.constant 1 : i32
    %0 = arith.muli %arg0, %c1_i32 : i32
    %1 = arith.addi %0, %arg1 : i32
    %c0_i32 = arith.constant 0 : i32
    %2 = arith.minsi %1, %c0_i32 : i32
    %c0_i32_0 = arith.constant 0 : i32
    %c0_i32_1 = arith.constant 0 : i32
    return %2, %c0_i32_0 : i32, i32
  }
  func.func @transform_1(%arg0: i32, %arg1: i32) -> (i32, i32) {
    %c1_i32 = arith.constant 1 : i32
    %0 = arith.muli %arg0, %c1_i32 : i32
    %1 = arith.addi %0, %arg1 : i32
    %c0_i32 = arith.constant 0 : i32
    %2 = arith.minsi %1, %c0_i32 : i32
    %c0_i32_0 = arith.constant 0 : i32
    %c0_i32_1 = arith.constant 0 : i32
    return %2, %c0_i32_0 : i32, i32
  }
  func.func @transform_2(%arg0: i32, %arg1: i32) -> (i32, i32) {
    %c1_i32 = arith.constant 1 : i32
    %0 = arith.muli %arg0, %c1_i32 : i32
    %1 = arith.addi %0, %arg1 : i32
    %c0_i32 = arith.constant 0 : i32
    %2 = arith.minsi %1, %c0_i32 : i32
    %c0_i32_0 = arith.constant 0 : i32
    %c0_i32_1 = arith.constant 0 : i32
    return %2, %c0_i32_0 : i32, i32
  }
  func.func @transform_3(%arg0: i32, %arg1: i32) -> (i32, i32) {
    %c1_i32 = arith.constant 1 : i32
    %0 = arith.muli %arg0, %c1_i32 : i32
    %1 = arith.addi %0, %arg1 : i32
    %c0_i32 = arith.constant 0 : i32
    %2 = arith.minsi %1, %c0_i32 : i32
    %c0_i32_0 = arith.constant 0 : i32
    %c0_i32_1 = arith.constant 0 : i32
    return %2, %c0_i32_0 : i32, i32
  }
  func.func @transform_4(%arg0: i32, %arg1: i32) -> (i32, i32, i32) {
    %c0_i32 = arith.constant 0 : i32
    %c0_i32_0 = arith.constant 0 : i32
    %c0_i32_1 = arith.constant 0 : i32
    return %arg0, %c0_i32, %c0_i32_0 : i32, i32, i32
  }
}

</mosaic_0001>

<bundles_post_ra>
// kernel: tpu_custom_call.1
= control target key start
LH: loop header
LB: loop body
LE: loop exit
PB: predicated region body
PF: predicated region fallthrough
CT: control target
= control target key end

     0   :  { %9 = vsyncpa [#allocation4], 0  ;;  %s379_s0 = inlined_call_operand.hbm [shape: f32[16,128], index: 0, kind: input, shape index: {}]   ;;  %s380_s1 = inlined_call_operand.hbm [shape: f32[16,128], index: 1, kind: input, shape index: {}]   ;;  %s381_s2 = inlined_call_operand.hbm [shape: f32[16,128], index: 2, kind: input, shape index: {}]   ;;  %s382_s3 = inlined_call_operand.hbm [shape: f32[16,128], index: 3, kind: input, shape index: {}]   ;;  %s383_s4 = inlined_call_operand.hbm [shape: f32[1,8,128], index: 4, kind: output, shape index: {}]  }
   0x1   :  { %10 = vsyncpa [#allocation7], 0 }
   0x2   :  { %11 = vsyncpa [#allocation10], 0 }
   0x3   :  { %12 = vsyncpa [#allocation5], 0  ;;  %s42_s17 = sshll.u32 %s380_s1, 4  ;;  %s332_s18 = smov [#allocation6]   ;;  %s43_s17 = int_to_ptr.hbm [resolvable:$true] %s42_s17 }
   0x4   :  { %s44_s19 = sshll.u32 %s332_s18, 4  ;;  %s23_s22 = sshll.u32 %s379_s0, 4  ;;  %s45_s19 = int_to_ptr.vmem [resolvable:$true] %s44_s19  ;;  %s24_s22 = int_to_ptr.hbm [resolvable:$true] %s23_s22 }
   0x5   :  { %s333_s23 = smov 128   ;;  %s334_s24 = smov 8  }
   0x6   :  { %50 = dma.hbm_to_vmem [thread:$0]  %s43_s17, 256, %s45_s19, [#allocation7], %s333_s23, %s333_s23, %s334_s24  }
   0x7   :  { %s335_s25 = smov [#allocation3]   ;;  %s61_s29 = sshll.u32 %s381_s2, 4  ;;  %s62_s29 = int_to_ptr.hbm [resolvable:$true] %s61_s29 }
   0x8   :  { %s25_s26 = sshll.u32 %s335_s25, 4  ;;  %s80_s5 = sshll.u32 %s382_s3, 4  ;;  %s26_s26 = int_to_ptr.vmem [resolvable:$true] %s25_s26  ;;  %s81_s5 = int_to_ptr.hbm [resolvable:$true] %s80_s5 }
   0x9   :  { %31 = dma.hbm_to_vmem [thread:$0]  %s24_s22, 256, %s26_s26, [#allocation4], %s333_s23, %s333_s23, %s334_s24  }
   0xa   :  { %s336_s6 = smov [#allocation8]   ;;  %s337_s0 = smov [#allocation9]  }
   0xb   :  { %s63_s7 = sshll.u32 %s336_s6, 4  ;;  %s82_s8 = sshll.u32 %s337_s0, 4  ;;  %s64_s7 = int_to_ptr.vmem [resolvable:$true] %s63_s7  ;;  %s83_s8 = int_to_ptr.vmem [resolvable:$true] %s82_s8 }
   0xc   :  { %69 = dma.hbm_to_vmem [thread:$0]  %s62_s29, 256, %s64_s7, [#allocation7], %s333_s23, %s333_s23, %s334_s24  }
   0xd   :  { %88 = dma.hbm_to_vmem [thread:$0]  %s81_s5, 256, %s83_s8, [#allocation10], %s333_s23, %s333_s23, %s334_s24  }
   0xe   :  { %324 = dma.done.wait [#allocation4], 256  }
   0xf   :  { %325 = vsyncadd [#allocation4], 4294967040 }
  0x10   :  { %326 = dma.done.wait [#allocation7], 512  }
  0x11   :  { %327 = vsyncadd [#allocation7], 4294966784 }
  0x12   :  { %328 = dma.done.wait [#allocation10], 256  }
  0x13   :  { %329 = vsyncadd [#allocation10], 4294967040  ;;  %v133_v0 = vld [vmem:[#allocation3] sm:$0xff]  ;;  %v134_v1 = vld [vmem:[#allocation3 + $0x8] sm:$0xff]  ;;  %s338_s2 = smov [#allocation11]   ;;  %s173_s11 = sshll.u32 %s383_s4, 4  ;;  %s174_s11 = int_to_ptr.hbm [resolvable:$true] %s173_s11 }
  0x14   :  { %v135_v2 = vld [vmem:[#allocation6] sm:$0xff]  ;;  %v137_v3 = vld [vmem:[#allocation8] sm:$0xff]  ;;  %v138_v4 = vld [vmem:[#allocation8 + $0x8] sm:$0xff]  ;;  %s171_s3 = sshll.u32 %s338_s2, 4  ;;  %s172_s3 = int_to_ptr.vmem [resolvable:$true] %s171_s3 }
  0x15   :  { %v136_v5 = vld [vmem:[#allocation6 + $0x8] sm:$0xff]  ;;  %v139_v6 = vld [vmem:[#allocation9] sm:$0xff]  ;;  %200 = vrcp.f32 %v137_v3  ;;  %v147_v12 = vsub.f32 %v133_v0, %v135_v2 }
  0x16   :  { %v140_v7 = vld [vmem:[#allocation9 + $0x8] sm:$0xff]  ;;  %v141_v8 = vsub.f32 1.0, %v139_v6  ;;  %202 = vrcp.f32 %v138_v4  ;;  %v148_v13 = vsub.f32 %v134_v1, %v136_v5 }
  0x17   :  { %v142_v9 = vsub.f32 1.0, %v140_v7 }
  0x18   :  { %v143_v10 = vmul.f32 %v141_v8, %v141_v8 }
  0x19   :  { %v144_v11 = vmul.f32 %v142_v9, %v142_v9 }
  0x1a   :  { %v145_v14 = vadd.f32 0.05, %v143_v10 }
  0x1b   :  { %v146_v15 = vadd.f32 0.05, %v144_v11  ;;  %v201_v16 = vpop.eup %200 }
  0x1c   :  { %v149_v17 = vmul.f32 %v147_v12, %v145_v14  ;;  %v203_v19 = vpop.eup %202 }
  0x1d   :  { %v150_v18 = vmul.f32 %v148_v13, %v146_v15 }
  0x1e   :  { %v151_v20 = vmul.f32 %v149_v17, %v147_v12 }
  0x1f   :  { %v152_v21 = vmul.f32 %v150_v18, %v148_v13 }
  0x20   :  { %v155_v22 = vmul.f32 %v201_v16, %v151_v20 }
  0x21   :  { %v156_v23 = vmul.f32 %v203_v19, %v152_v21 }
  0x23   :  { %v158_v24 = vadd.f32 %v156_v23, %v155_v22 }
  0x25   :  { %165 = vst [vmem:[#allocation11] sm:$0xff] %v158_v24 }
  0x26   :  { %176 = dma.vmem_to_hbm [thread:$0]  %s172_s3, 128, %s174_s11, [#allocation5]  }
  0x27   :  { %330 = dma.done.wait [#allocation5], 128  }
  0x28   :  { %331 = vsyncadd [#allocation5], 4294967168 }
  0x29   :  { %181 = vsyncpa [#allocation4], 1 }
  0x2a   :  { %182 = vsyncpa [#allocation7], 1 }
  0x2b   :  { %183 = vsyncpa [#allocation10], 1 }
  0x2c   :  { %184 = vsyncpa [#allocation5], 1 }

</bundles_post_ra>
